<compile_context>
chip_gen: v7x
topology: tpu7x:2x2x1
jax: 0.10.0
libtpu: 0.0.40
codegen_flags: <defaults>
</compile_context>

<pallas_src>
import functools

import jax
import jax.numpy as jnp
from jax.experimental import pallas as pl
from jax.experimental.pallas import tpu as pltpu


def _round_up(v, m):
    return (v + m - 1) // m * m


def _fused_gcn_block_kernel(n_layers, sum_res, reorder_first,
                            a_ref, x_ref, w0_ref, b0_ref, ws_ref, bs_ref, o_ref):
    """All GCN layers fused. a: (Np,Np), x: (Np,Cin), w0: (Cin,CP), b0: (1,CP),
    ws: (L-1,CP,CP), bs: (L-1,1,CP), out: (Np,CP). Everything stays VMEM-resident."""
    a = a_ref[...]
    x = x_ref[...]

    # ---- layer 0 (no activation) ----
    if reorder_first:
        # (A @ X) @ W0: cheaper when Cin < Cout (smaller contraction + intermediate).
        ax = jnp.dot(a, x, preferred_element_type=jnp.float32)
        h0 = jnp.dot(ax, w0_ref[...], preferred_element_type=jnp.float32) + b0_ref[...]
    else:
        xw = jnp.dot(x, w0_ref[...], preferred_element_type=jnp.float32)
        h0 = jnp.dot(a, xw, preferred_element_type=jnp.float32) + b0_ref[...]

    # ---- layers 1..L-1 (ReLU), statically unrolled (n_layers is small & static) ----
    h = h0
    for l in range(n_layers - 1):
        hw = jnp.dot(h, ws_ref[l], preferred_element_type=jnp.float32)
        h = jnp.maximum(jnp.dot(a, hw, preferred_element_type=jnp.float32) + bs_ref[l], 0.0)

    if sum_res:
        h = h + h0
    o_ref[...] = h.astype(o_ref.dtype)


def gcn_block_pallas(a_hat, x, params, *, sum_res=True):
    """Fused GCNBlock forward. params = [(W0,b0), (W1,b1), ...]; returns (N, out_channels)."""
    n, c_in = x.shape
    c_out = params[0][0].shape[1]
    n_layers = len(params)
    assert n_layers >= 2, "GCNBlock requires n_layers > 1"

    LANE = 128
    cp = _round_up(c_out, LANE)   # lane-dense feature width for intermediates/output
    mp = _round_up(n, 8)          # sublane-aligned node count

    # Zero padding is mathematically inert: padded feature columns stay exactly zero through
    # every layer; padded node rows never feed back into real rows (their A columns are zero).
    a_p = jnp.zeros((mp, mp), jnp.float32).at[:n, :n].set(a_hat)
    x_p = jnp.zeros((mp, c_in), jnp.float32).at[:n, :].set(x)

    w0, b0 = params[0]
    w0_p = jnp.zeros((c_in, cp), jnp.float32).at[:, :c_out].set(w0)
    b0_p = jnp.zeros((1, cp), jnp.float32).at[0, :c_out].set(b0)

    ws = jnp.stack([jnp.zeros((cp, cp), jnp.float32).at[:c_out, :c_out].set(w)
                    for (w, _) in params[1:]])                       # (L-1, CP, CP)
    bs = jnp.stack([jnp.zeros((1, cp), jnp.float32).at[0, :c_out].set(b)
                    for (_, b) in params[1:]])                       # (L-1, 1, CP)

    reorder_first = c_in < c_out
    kernel = functools.partial(_fused_gcn_block_kernel, n_layers, sum_res, reorder_first)

    # Advisory cost estimate for the XLA scheduler.
    flops = (2 * mp * mp * (c_in if reorder_first else cp)
             + 2 * mp * c_in * cp
             + (n_layers - 1) * (2 * mp * cp * cp + 2 * mp * mp * cp))
    bytes_accessed = 4 * (mp * mp + mp * c_in + c_in * cp + cp
                          + (n_layers - 1) * (cp * cp + cp) + mp * cp)
    cost = pl.CostEstimate(flops=flops, transcendentals=0, bytes_accessed=bytes_accessed)

    out_p = pl.pallas_call(
        kernel,
        out_shape=jax.ShapeDtypeStruct((mp, cp), jnp.float32),
        grid=(1,),
        in_specs=[
            pl.BlockSpec((mp, mp), lambda i: (0, 0)),                 # A_hat
            pl.BlockSpec((mp, c_in), lambda i: (0, 0)),               # X
            pl.BlockSpec((c_in, cp), lambda i: (0, 0)),               # W0 (lane-padded)
            pl.BlockSpec((1, cp), lambda i: (0, 0)),                  # b0
            pl.BlockSpec((n_layers - 1, cp, cp), lambda i: (0, 0, 0)),  # stacked W_1..L-1
            pl.BlockSpec((n_layers - 1, 1, cp), lambda i: (0, 0, 0)),   # stacked b_1..L-1
        ],
        out_specs=pl.BlockSpec((mp, cp), lambda i: (0, 0)),
        compiler_params=pltpu.CompilerParams(dimension_semantics=("arbitrary",)),
        cost_estimate=cost,
    )(a_p, x_p, w0_p, b0_p, ws, bs)

    return out_p[:n, :c_out]


def build_normalized_adjacency(edge_index, num_nodes):
    """Dense D^{-1/2}(A+I)D^{-1/2} from edge_index (2, E). adj[dst, src] = 1 (PyG convention)."""
    src, dst = edge_index[0], edge_index[1]
    adj = jnp.zeros((num_nodes, num_nodes), jnp.float32).at[dst, src].set(1.0)
    adj = adj + jnp.eye(num_nodes, dtype=jnp.float32)          # add self loops
    deg = adj.sum(axis=1)                                       # in-degree (incl. self loop)
    d_inv_sqrt = jnp.where(deg > 0, 1.0 / jnp.sqrt(deg), 0.0)
    return d_inv_sqrt[:, None] * adj * d_inv_sqrt[None, :]


def glorot(key, shape):
    fan_in, fan_out = shape
    limit = jnp.sqrt(6.0 / (fan_in + fan_out))
    return jax.random.uniform(key, shape, jnp.float32, -limit, limit)


def init_gcn_block_params(key, in_channels, out_channels, n_layers):
    params = []
    keys = jax.random.split(key, n_layers)
    for i in range(n_layers):
        c_in = in_channels if i == 0 else out_channels
        w = glorot(keys[i], (c_in, out_channels))
        b = jnp.zeros((out_channels,), jnp.float32)
        params.append((w, b))
    return params


def gcn_block_forward(params, x, edge_index, *, sum_res=True):
    """Forward pass of GCNBlock: dense normalized adjacency (JAX glue) + one fused Pallas kernel."""
    a_hat = build_normalized_adjacency(edge_index, x.shape[0])
    return gcn_block_pallas(a_hat, x, params, sum_res=sum_res)


def gcn_block_reference(params, x, edge_index, *, sum_res=True):
    """Pure-jnp reference for correctness checking."""
    a_hat = build_normalized_adjacency(edge_index, x.shape[0])
    w0, b0 = params[0]
    x_temp = a_hat @ (x @ w0) + b0
    h = x_temp
    for w, b in params[1:]:
        h = jnp.maximum(a_hat @ (h @ w) + b, 0.0)
    return h + x_temp if sum_res else h


if __name__ == "__main__":
    N = 16            # number of graph nodes
    IN_CHANNELS = 8
    OUT_CHANNELS = 32
    N_LAYERS = 3

    key = jax.random.PRNGKey(0)
    k_x, k_p = jax.random.split(key)

    # node features
    x = jax.random.normal(k_x, (N, IN_CHANNELS), jnp.float32)

    # deterministic ring graph, both directions: edge_index shape (2, 2N)
    idx = jnp.arange(N)
    src = jnp.concatenate([idx, (idx + 1) % N])
    dst = jnp.concatenate([(idx + 1) % N, idx])
    edge_index = jnp.stack([src, dst], axis=0).astype(jnp.int32)

    params = init_gcn_block_params(k_p, IN_CHANNELS, OUT_CHANNELS, N_LAYERS)

    out = gcn_block_forward(params, x, edge_index, sum_res=True)
    out = jax.block_until_ready(out)

    ref = gcn_block_reference(params, x, edge_index, sum_res=True)
    assert out.shape == (N, OUT_CHANNELS)
    assert jnp.allclose(out, ref, atol=1e-4, rtol=1e-4), "mismatch vs reference"

    print("KERNEL_OK")
</pallas_src>

<mosaic_0001>
module attributes {stable_mosaic.version = 11 : i64} {
  func.func @_fused_gcn_block_kernel(%arg0: i32, %arg1: memref<16x16xf32, #tpu.memory_space<vmem>>, %arg2: memref<16x8xf32, #tpu.memory_space<vmem>>, %arg3: memref<8x128xf32, #tpu.memory_space<vmem>>, %arg4: memref<1x128xf32, #tpu.memory_space<vmem>>, %arg5: memref<2x128x128xf32, #tpu.memory_space<vmem>>, %arg6: memref<2x1x128xf32, #tpu.memory_space<vmem>>, %arg7: memref<16x128xf32, #tpu.memory_space<vmem>>) attributes {dimension_semantics = [#tpu.dimension_semantics<arbitrary>], iteration_bounds = array<i64: 1>, scalar_prefetch = 0 : i64, scratch_operands = 0 : i64, tpu.core_type = #tpu.core_type<tc>, window_params = [{pipeline_mode = #tpu.pipeline_mode<synchronous>, transform_indices = @transform_0, window_bounds = array<i64: 16, 16>}, {pipeline_mode = #tpu.pipeline_mode<synchronous>, transform_indices = @transform_1, window_bounds = array<i64: 16, 8>}, {pipeline_mode = #tpu.pipeline_mode<synchronous>, transform_indices = @transform_2, window_bounds = array<i64: 8, 128>}, {pipeline_mode = #tpu.pipeline_mode<synchronous>, transform_indices = @transform_3, window_bounds = array<i64: 1, 128>}, {pipeline_mode = #tpu.pipeline_mode<synchronous>, transform_indices = @transform_4, window_bounds = array<i64: 2, 128, 128>}, {pipeline_mode = #tpu.pipeline_mode<synchronous>, transform_indices = @transform_5, window_bounds = array<i64: 2, 1, 128>}, {pipeline_mode = #tpu.pipeline_mode<synchronous>, transform_indices = @transform_6, window_bounds = array<i64: 16, 128>}]} {
    %c0 = arith.constant 0 : index
    %c0_0 = arith.constant 0 : index
    %0 = vector.load %arg1[%c0, %c0_0] : memref<16x16xf32, #tpu.memory_space<vmem>>, vector<16x16xf32>
    %c0_1 = arith.constant 0 : index
    %c0_2 = arith.constant 0 : index
    %1 = vector.load %arg2[%c0_1, %c0_2] : memref<16x8xf32, #tpu.memory_space<vmem>>, vector<16x8xf32>
    %cst = arith.constant dense<0.000000e+00> : vector<16x8xf32>
    %2 = tpu.matmul %0, %1, %cst {dimension_numbers = #tpu.dot_dimension_numbers<[1], [0], [0], [1], [0, 0, 1, 1], [], []>} : vector<16x16xf32>, vector<16x8xf32>, vector<16x8xf32> -> vector<16x8xf32>
    %c0_3 = arith.constant 0 : index
    %c0_4 = arith.constant 0 : index
    %3 = vector.load %arg3[%c0_3, %c0_4] : memref<8x128xf32, #tpu.memory_space<vmem>>, vector<8x128xf32>
    %cst_5 = arith.constant dense<0.000000e+00> : vector<16x128xf32>
    %4 = tpu.matmul %2, %3, %cst_5 {dimension_numbers = #tpu.dot_dimension_numbers<[1], [0], [0], [1], [0, 0, 1, 1], [], []>} : vector<16x8xf32>, vector<8x128xf32>, vector<16x128xf32> -> vector<16x128xf32>
    %c0_6 = arith.constant 0 : index
    %c0_7 = arith.constant 0 : index
    %5 = vector.load %arg4[%c0_6, %c0_7] : memref<1x128xf32, #tpu.memory_space<vmem>>, vector<1x128xf32>
    %6 = vector.broadcast %5 : vector<1x128xf32> to vector<16x128xf32>
    %7 = arith.addf %4, %6 : vector<16x128xf32>
    %c0_8 = arith.constant 0 : index
    %c0_9 = arith.constant 0 : index
    %c0_10 = arith.constant 0 : index
    %8 = vector.load %arg5[%c0_8, %c0_9, %c0_10] : memref<2x128x128xf32, #tpu.memory_space<vmem>>, vector<1x128x128xf32>
    %9 = vector.shape_cast %8 : vector<1x128x128xf32> to vector<128x128xf32>
    %cst_11 = arith.constant dense<0.000000e+00> : vector<16x128xf32>
    %10 = tpu.matmul %7, %9, %cst_11 {dimension_numbers = #tpu.dot_dimension_numbers<[1], [0], [0], [1], [0, 0, 1, 1], [], []>} : vector<16x128xf32>, vector<128x128xf32>, vector<16x128xf32> -> vector<16x128xf32>
    %cst_12 = arith.constant dense<0.000000e+00> : vector<16x128xf32>
    %11 = tpu.matmul %0, %10, %cst_12 {dimension_numbers = #tpu.dot_dimension_numbers<[1], [0], [0], [1], [0, 0, 1, 1], [], []>} : vector<16x16xf32>, vector<16x128xf32>, vector<16x128xf32> -> vector<16x128xf32>
    %c0_13 = arith.constant 0 : index
    %c0_14 = arith.constant 0 : index
    %c0_15 = arith.constant 0 : index
    %12 = vector.load %arg6[%c0_13, %c0_14, %c0_15] : memref<2x1x128xf32, #tpu.memory_space<vmem>>, vector<1x1x128xf32>
    %13 = vector.shape_cast %12 : vector<1x1x128xf32> to vector<1x128xf32>
    %14 = vector.broadcast %13 : vector<1x128xf32> to vector<16x128xf32>
    %15 = arith.addf %11, %14 : vector<16x128xf32>
    %cst_16 = arith.constant 0.000000e+00 : f32
    %16 = vector.broadcast %cst_16 : f32 to vector<16x128xf32>
    %17 = arith.maximumf %15, %16 : vector<16x128xf32>
    %c1 = arith.constant 1 : index
    %c0_17 = arith.constant 0 : index
    %c0_18 = arith.constant 0 : index
    %18 = vector.load %arg5[%c1, %c0_17, %c0_18] : memref<2x128x128xf32, #tpu.memory_space<vmem>>, vector<1x128x128xf32>
    %19 = vector.shape_cast %18 : vector<1x128x128xf32> to vector<128x128xf32>
    %cst_19 = arith.constant dense<0.000000e+00> : vector<16x128xf32>
    %20 = tpu.matmul %17, %19, %cst_19 {dimension_numbers = #tpu.dot_dimension_numbers<[1], [0], [0], [1], [0, 0, 1, 1], [], []>} : vector<16x128xf32>, vector<128x128xf32>, vector<16x128xf32> -> vector<16x128xf32>
    %cst_20 = arith.constant dense<0.000000e+00> : vector<16x128xf32>
    %21 = tpu.matmul %0, %20, %cst_20 {dimension_numbers = #tpu.dot_dimension_numbers<[1], [0], [0], [1], [0, 0, 1, 1], [], []>} : vector<16x16xf32>, vector<16x128xf32>, vector<16x128xf32> -> vector<16x128xf32>
    %c1_21 = arith.constant 1 : index
    %c0_22 = arith.constant 0 : index
    %c0_23 = arith.constant 0 : index
    %22 = vector.load %arg6[%c1_21, %c0_22, %c0_23] : memref<2x1x128xf32, #tpu.memory_space<vmem>>, vector<1x1x128xf32>
    %23 = vector.shape_cast %22 : vector<1x1x128xf32> to vector<1x128xf32>
    %24 = vector.broadcast %23 : vector<1x128xf32> to vector<16x128xf32>
    %25 = arith.addf %21, %24 : vector<16x128xf32>
    %cst_24 = arith.constant 0.000000e+00 : f32
    %26 = vector.broadcast %cst_24 : f32 to vector<16x128xf32>
    %27 = arith.maximumf %25, %26 : vector<16x128xf32>
    %28 = arith.addf %27, %7 : vector<16x128xf32>
    %c0_25 = arith.constant 0 : index
    %c0_26 = arith.constant 0 : index
    %29 = vector.load %arg7[%c0_25, %c0_26] : memref<16x128xf32, #tpu.memory_space<vmem>>, vector<16x128xf32>
    tpu.vector_store %arg7[%c0_25, %c0_26], %28 {strides = array<i32>} : memref<16x128xf32, #tpu.memory_space<vmem>>, vector<16x128xf32>,
    return
  }
  func.func @transform_0(%arg0: i32) -> (i32, i32) {
    %c0_i32 = arith.constant 0 : i32
    %c0_i32_0 = arith.constant 0 : i32
    %c0_i32_1 = arith.constant 0 : i32
    return %c0_i32, %c0_i32_0 : i32, i32
  }
  func.func @transform_1(%arg0: i32) -> (i32, i32) {
    %c0_i32 = arith.constant 0 : i32
    %c0_i32_0 = arith.constant 0 : i32
    %c0_i32_1 = arith.constant 0 : i32
    return %c0_i32, %c0_i32_0 : i32, i32
  }
  func.func @transform_2(%arg0: i32) -> (i32, i32) {
    %c0_i32 = arith.constant 0 : i32
    %c0_i32_0 = arith.constant 0 : i32
    %c0_i32_1 = arith.constant 0 : i32
    return %c0_i32, %c0_i32_0 : i32, i32
  }
  func.func @transform_3(%arg0: i32) -> (i32, i32) {
    %c0_i32 = arith.constant 0 : i32
    %c0_i32_0 = arith.constant 0 : i32
    %c0_i32_1 = arith.constant 0 : i32
    return %c0_i32, %c0_i32_0 : i32, i32
  }
  func.func @transform_4(%arg0: i32) -> (i32, i32, i32) {
    %c0_i32 = arith.constant 0 : i32
    %c0_i32_0 = arith.constant 0 : i32
    %c0_i32_1 = arith.constant 0 : i32
    %c0_i32_2 = arith.constant 0 : i32
    return %c0_i32, %c0_i32_0, %c0_i32_1 : i32, i32, i32
  }
  func.func @transform_5(%arg0: i32) -> (i32, i32, i32) {
    %c0_i32 = arith.constant 0 : i32
    %c0_i32_0 = arith.constant 0 : i32
    %c0_i32_1 = arith.constant 0 : i32
    %c0_i32_2 = arith.constant 0 : i32
    return %c0_i32, %c0_i32_0, %c0_i32_1 : i32, i32, i32
  }
  func.func @transform_6(%arg0: i32) -> (i32, i32) {
    %c0_i32 = arith.constant 0 : i32
    %c0_i32_0 = arith.constant 0 : i32
    %c0_i32_1 = arith.constant 0 : i32
    return %c0_i32, %c0_i32_0 : i32, i32
  }
}

</mosaic_0001>

<bundles_post_ra>
// kernel: tpu_custom_call.1
= control target key start
LH: loop header
LB: loop body
LE: loop exit
PB: predicated region body
PF: predicated region fallthrough
CT: control target
= control target key end

     0   :  { %11 = vsyncpa [#allocation3], 0  ;;  %s991_s0 = inlined_call_operand.vmem [shape: f32[16,16], index: 0, kind: input, shape index: {}]   ;;  %s992_s1 = inlined_call_operand.vmem [shape: f32[16,8], index: 1, kind: input, shape index: {}]   ;;  %s993_s2 = inlined_call_operand.vmem [shape: f32[8,128], index: 2, kind: input, shape index: {}]   ;;  %s994_s3 = inlined_call_operand.vmem [shape: f32[1,128], index: 3, kind: input, shape index: {}]   ;;  %s995_s4 = inlined_call_operand.hbm [shape: f32[2,128,128], index: 4, kind: input, shape index: {}]   ;;  %s996_s5 = inlined_call_operand.vmem [shape: f32[2,1,128], index: 5, kind: input, shape index: {}]   ;;  %s997_s6 = inlined_call_operand.hbm [shape: f32[16,128], index: 6, kind: output, shape index: {}]  }
   0x1   :  { %12 = vsyncpa [#allocation4], 0  ;;  %s874_s21 = smov [#allocation2]   ;;  %s826_s25 = scalar_lea.hbm %s995_s4, 4096 }
   0x2   :  { %s26_s22 = sshll.u32 %s874_s21, 4  ;;  %p827_p0 = scmp.ne.s32.totalorder %s995_s4, %s826_s25  ;;  %s27_s22 = int_to_ptr.vmem [resolvable:$true] %s26_s22 }
   0x3   :  { %p830_p1 = scmp.lt.u32.totalorder %s826_s25, %s995_s4 }
   0x5   :  { %p832_p2 = pnand %p830_p1, %p827_p0 }
   0x7   :  { %835 = shalt.err (!%p832_p2)
}
   0x8   :  { %s836_s30 = scalar_lea.vmem %s27_s22, 4096  ;;  %p841_p4 = scmp.lt.s32.totalorder %s27_s22, %s27_s22 }
   0x9   :  { %p837_p3 = scmp.ne.s32.totalorder %s27_s22, %s836_s30  ;;  %p842_p5 = scmp.lt.s32.totalorder %s836_s30, %s836_s30 }
   0xb   :  { %p843_p6 = por %p842_p5, %p841_p4 }
   0xd   :  { %p844_p7 = pnand %p843_p6, %p837_p3 }
   0xf   :  { %847 = shalt.err (!%p844_p7)
}
  0x10   :  { %s875_s7 = smov 128   ;;  %s876_s8 = smov 8  }
  0x11   :  { %32 = dma.hbm_to_vmem [thread:$0]  %s995_s4, 4096, %s27_s22, [#allocation3], %s875_s7, %s875_s7, %s876_s8  }
  0x12   :  { %870 = dma.done.wait [#allocation3], 4096  }
  0x13   :  { %871 = vsyncadd [#allocation3], 4294963200  ;;  %vm42_vm0 = vcmask 130048   ;;  %v40_v0 = vld [vmem:[%s992_s1] sm:$0xff]  ;;  %v41_v1 = vld [vmem:[%s992_s1 + $0x8] sm:$0xff]  ;;  %vm132_vm1 = vcmask 64512  }
  0x14   :  { %v937_v2 = vld [vmem:[%s991_s0] sm:$0xff]  ;;  %v746_v3 = vpack.c.bf16 %v41_v1, %v40_v0  ;;  %v944_v4 = vld [vmem:[%s991_s0 + $0x8] sm:$0xff]  ;;  %v216_v9 = vld [vmem:[#allocation2 + $0x10] sm:$0xff]  ;;  %s877_s22 = smov [#allocation5]  }
  0x15   :  { %654 = vmatprep.mubr.msk.f32.mxu0 %vm42_vm0, %v937_v2  ;;  %v124_v5 = vld [vmem:[%s993_s2] sm:$0xff]  ;;  %v215_v7 = vld [vmem:[#allocation2 + $0x8] sm:$0xff]  ;;  %v217_v10 = vld [vmem:[#allocation2 + $0x18] sm:$0xff]  ;;  %s575_s23 = sshll.u32 %s877_s22, 4  ;;  %s576_s23 = int_to_ptr.vmem [resolvable:$true] %s575_s23 }
  0x16   :  { %747 = vmatprep.subr.bf16.mxu0 %v746_v3  ;;  %657 = vmatprep.subr.mxu1 %v124_v5  ;;  %v214_v6 = vld [vmem:[#allocation2] sm:$0xff]  ;;  %v754_v13 = vpack.c.bf16 %v217_v10, %v216_v9  ;;  %v219_v15 = vld [vmem:[#allocation2 + $0x28] sm:$0xff]  ;;  %v220_v17 = vld [vmem:[#allocation2 + $0x30] sm:$0xff]  ;;  %s848_s24 = scalar_lea.vmem %s576_s23, 256  ;;  %p853_p9 = scmp.lt.s32.totalorder %s576_s23, %s576_s23 }
  0x17   :  { %749 = vmatpush3.bf16.msra.mxu0 %v746_v3  ;;  %658 = vmatpush3.msra.mxu1 %v124_v5  ;;  %v750_v8 = vpack.c.bf16 %v215_v7, %v214_v6  ;;  %v218_v14 = vld [vmem:[#allocation2 + $0x20] sm:$0xff]  ;;  %v221_v18 = vld [vmem:[#allocation2 + $0x38] sm:$0xff]  ;;  %v223_v21 = vld [vmem:[#allocation2 + $0x48] sm:$0xff]  ;;  %p849_p8 = scmp.ne.s32.totalorder %s576_s23, %s848_s24  ;;  %p854_p10 = scmp.lt.s32.totalorder %s848_s24, %s848_s24 }
  0x18   :  { %v758_v16 = vpack.c.bf16 %v219_v15, %v218_v14  ;;  %v762_v19 = vpack.c.bf16 %v221_v18, %v220_v17  ;;  %v222_v20 = vld [vmem:[#allocation2 + $0x40] sm:$0xff]  ;;  %v224_v23 = vld [vmem:[#allocation2 + $0x50] sm:$0xff]  ;;  %v225_v24 = vld [vmem:[#allocation2 + $0x58] sm:$0xff] }
  0x19   :  { %751 = vmatprep.subr.bf16.mxu1 %v750_v8  ;;  %v766_v22 = vpack.c.bf16 %v223_v21, %v222_v20  ;;  %v770_v25 = vpack.c.bf16 %v225_v24, %v224_v23  ;;  %v226_v26 = vld [vmem:[#allocation2 + $0x60] sm:$0xff]  ;;  %v227_v27 = vld [vmem:[#allocation2 + $0x68] sm:$0xff]  ;;  %v228_v29 = vld [vmem:[#allocation2 + $0x70] sm:$0xff]  ;;  %p855_p11 = por %p854_p10, %p853_p9 }
  0x1a   :  { %655 = vmatmul.mubr.msk.f32.vlgmr.msra.gmra.mrb[0].mxu0 %vm42_vm0, %v944_v4  ;;  %v774_v28 = vpack.c.bf16 %v227_v27, %v226_v26  ;;  %v229_v30 = vld [vmem:[#allocation2 + $0x78] sm:$0xff]  ;;  %v589_v32 = vld [vmem:[%s994_s3] ss:$0 sm:$0xff]  ;;  %v391_v38 = vld [vmem:[#allocation2 + $0x88] sm:$0xff] }
  0x1b   :  { %701 = vmatprep.mubr.msk.f32.mxu0 %vm42_vm0, %v937_v2  ;;  %v778_v31 = vpack.c.bf16 %v229_v30, %v228_v29  ;;  %v390_v37 = vld [vmem:[#allocation2 + $0x80] sm:$0xff]  ;;  %v392_v43 = vld [vmem:[#allocation2 + $0x90] sm:$0xff]  ;;  %v393_v44 = vld [vmem:[#allocation2 + $0x98] sm:$0xff]  ;;  %p856_p12 = pnand %p855_p11, %p849_p8 }
  0x1c   :  { %v786_v42 = vpack.c.bf16 %v391_v38, %v390_v37  ;;  %v790_v45 = vpack.c.bf16 %v393_v44, %v392_v43  ;;  %v394_v46 = vld [vmem:[#allocation2 + $0xa0] sm:$0xff]  ;;  %v395_v47 = vld [vmem:[#allocation2 + $0xa8] sm:$0xff]  ;;  %v396_v49 = vld [vmem:[#allocation2 + $0xb0] sm:$0xff] }
  0x1d   :  { %v794_v48 = vpack.c.bf16 %v395_v47, %v394_v46  ;;  %v397_v50 = vld [vmem:[#allocation2 + $0xb8] sm:$0xff]  ;;  %v398_v52 = vld [vmem:[#allocation2 + $0xc0] sm:$0xff]  ;;  %v399_v53 = vld [vmem:[#allocation2 + $0xc8] sm:$0xff] }
  0x1e   :  { %v798_v51 = vpack.c.bf16 %v397_v50, %v396_v49  ;;  %v802_v54 = vpack.c.bf16 %v399_v53, %v398_v52  ;;  %v400_v55 = vld [vmem:[#allocation2 + $0xd0] sm:$0xff]  ;;  %v401_v56 = vld [vmem:[#allocation2 + $0xd8] sm:$0xff]  ;;  %v402_v58 = vld [vmem:[#allocation2 + $0xe0] sm:$0xff] }
  0x1f   :  { %v806_v57 = vpack.c.bf16 %v401_v56, %v400_v55  ;;  %v403_v59 = vld [vmem:[#allocation2 + $0xe8] sm:$0xff]  ;;  %v404_v61 = vld [vmem:[#allocation2 + $0xf0] sm:$0xff]  ;;  %v405_v62 = vld [vmem:[#allocation2 + $0xf8] sm:$0xff] }
  0x20   :  { %v810_v60 = vpack.c.bf16 %v403_v59, %v402_v58  ;;  %v814_v63 = vpack.c.bf16 %v405_v62, %v404_v61  ;;  %v592_v0 = vld [vmem:[%s996_s5] ss:$0 sm:$0xff] }
  0xed   :  { %v656_v11 = vpop.f32.mrb[0].mxu0 }
  0xee   :  { %v115_v12 = vpop.f32.mrb[1].mxu0 }
  0xef   :  { %659 = vmatprep.mubr.msk.f32.mxu1 %vm132_vm1, %v115_v12 }
  0xf0   :  { %660 = vmatmul.mubr.msk.f32.vlgmr.msra.gmra.mrb[0].mxu1 %vm132_vm1, %v656_v11  ;;  %v596_v11 = vld [vmem:[%s996_s5 + $0x1] ss:$0 sm:$0xff] }
  0xf1   :  { %753 = vmatpush3.bf16.msra.mxu1 %v750_v8 }
  0xf2   :  { %755 = vmatprep.subr.bf16.mxu1 %v754_v13 }
  0xf5   :  { %757 = vmatpush3.bf16.msra.mxu1 %v754_v13 }
  0xf6   :  { %759 = vmatprep.subr.bf16.mxu1 %v758_v16 }
  0xf9   :  { %761 = vmatpush3.bf16.msra.mxu1 %v758_v16 }
  0xfa   :  { %763 = vmatprep.subr.bf16.mxu1 %v762_v19 }
  0xfd   :  { %765 = vmatpush3.bf16.msra.mxu1 %v762_v19 }
  0xfe   :  { %767 = vmatprep.subr.bf16.mxu1 %v766_v22 }
 0x101   :  { %769 = vmatpush3.bf16.msra.mxu1 %v766_v22 }
 0x102   :  { %771 = vmatprep.subr.bf16.mxu1 %v770_v25 }
 0x105   :  { %773 = vmatpush3.bf16.msra.mxu1 %v770_v25 }
 0x106   :  { %775 = vmatprep.subr.bf16.mxu1 %v774_v28 }
 0x109   :  { %777 = vmatpush3.bf16.msra.mxu1 %v774_v28 }
 0x10a   :  { %779 = vmatprep.subr.bf16.mxu1 %v778_v31 }
 0x10d   :  { %781 = vmatpush3.bf16.msra.mxu1 %v778_v31 }
 0x1c3   :  { %v661_v33 = vpop.f32.mrb[0].mxu1 }
 0x1c4   :  { %v205_v34 = vpop.f32.mrb[1].mxu1  ;;  %v958_v36 = vadd.f32 %v661_v33, %v589_v32 }
 0x1c5   :  { %v956_v35 = vadd.f32 %v589_v32, %v205_v34 }
 0x1c7   :  { %694 = vmatprep.mubr.f32.mxu1 %v956_v35 }
 0x1c8   :  { %695 = vmatmul.mubr.f32.vlgmr.msra.gmra.mrb[2].mxu1 %v958_v36 }
 0x1c9   :  { %743 = vmatprep.mubr.msk.f32.mxu1 %vm42_vm0, %v937_v2 }
 0x29b   :  { %v696_v39 = vpop.f32.mrb[2].mxu1 }
 0x29c   :  { %v296_v40 = vpop.f32.mrb[3].mxu1 }
 0x29d   :  { %v782_v41 = vpack.c.bf16 %v696_v39, %v296_v40 }
 0x29f   :  { %783 = vmatprep.subr.bf16.mxu0 %v782_v41 }
 0x2a0   :  { %785 = vmatpush3.bf16.msra.mxu0 %v782_v41 }
 0x2a1   :  { %787 = vmatprep.subr.bf16.mxu0 %v786_v42 }
 0x2a3   :  { %702 = vmatmul.mubr.msk.f32.vlgmr.msra.gmra.mrb[2].mxu0 %vm42_vm0, %v944_v4 }
 0x2a4   :  { %789 = vmatpush3.bf16.msra.mxu0 %v786_v42 }
 0x2a5   :  { %791 = vmatprep.subr.bf16.mxu0 %v790_v45 }
 0x2a8   :  { %793 = vmatpush3.bf16.msra.mxu0 %v790_v45 }
 0x2a9   :  { %795 = vmatprep.subr.bf16.mxu0 %v794_v48 }
 0x2ac   :  { %797 = vmatpush3.bf16.msra.mxu0 %v794_v48 }
 0x2ad   :  { %799 = vmatprep.subr.bf16.mxu0 %v798_v51 }
 0x2b0   :  { %801 = vmatpush3.bf16.msra.mxu0 %v798_v51 }
 0x2b1   :  { %803 = vmatprep.subr.bf16.mxu0 %v802_v54 }
 0x2b4   :  { %805 = vmatpush3.bf16.msra.mxu0 %v802_v54 }
 0x2b5   :  { %807 = vmatprep.subr.bf16.mxu0 %v806_v57 }
 0x2b8   :  { %809 = vmatpush3.bf16.msra.mxu0 %v806_v57 }
 0x2b9   :  { %811 = vmatprep.subr.bf16.mxu0 %v810_v60 }
 0x2bc   :  { %813 = vmatpush3.bf16.msra.mxu0 %v810_v60 }
 0x2bd   :  { %815 = vmatprep.subr.bf16.mxu0 %v814_v63 }
 0x2c0   :  { %817 = vmatpush3.bf16.msra.mxu0 %v814_v63 }
 0x376   :  { %v703_v1 = vpop.f32.mrb[2].mxu0 }
 0x377   :  { %v384_v2 = vadd.f32 %v703_v1, %v592_v0  ;;  %v378_v3 = vpop.f32.mrb[3].mxu0 }
 0x378   :  { %v379_v5 = vadd.f32 %v592_v0, %v378_v3 }
 0x379   :  { %v388_v7 = vmax.f32 %v384_v2, 0.0 }
 0x37a   :  { %v387_v6 = vmax.f32 %v379_v5, 0.0 }
 0x37c   :  { %736 = vmatprep.mubr.f32.mxu0 %v387_v6 }
 0x37d   :  { %737 = vmatmul.mubr.f32.vlgmr.msra.gmra.mrb[4].mxu0 %v388_v7 }
 0x450   :  { %v738_v8 = vpop.f32.mrb[4].mxu0 }
 0x451   :  { %v472_v9 = vpop.f32.mrb[5].mxu0 }
 0x452   :  { %v818_v10 = vpack.c.bf16 %v738_v8, %v472_v9 }
 0x454   :  { %819 = vmatprep.subr.bf16.mxu1 %v818_v10 }
 0x455   :  { %821 = vmatpush3.bf16.msra.mxu1 %v818_v10 }
 0x458   :  { %744 = vmatmul.mubr.msk.f32.vlgmr.msra.gmra.mrb[4].mxu1 %vm42_vm0, %v944_v4 }
 0x52b   :  { %v745_v12 = vpop.f32.mrb[4].mxu1 }
 0x52c   :  { %v561_v13 = vadd.f32 %v745_v12, %v596_v11  ;;  %v555_v14 = vpop.f32.mrb[5].mxu1 }
 0x52d   :  { %v556_v15 = vadd.f32 %v596_v11, %v555_v14 }
 0x52e   :  { %v565_v16 = vmax.f32 %v561_v13, 0.0 }
 0x52f   :  { %v564_v17 = vmax.f32 %v556_v15, 0.0 }
 0x530   :  { %v567_v18 = vadd.f32 %v565_v16, %v958_v36 }
 0x531   :  { %v566_v19 = vadd.f32 %v564_v17, %v956_v35 }
 0x532   :  { %569 = vst [vmem:[#allocation5 + $0x8] sm:$0xff] %v567_v18 }
 0x533   :  { %568 = vst [vmem:[#allocation5] sm:$0xff] %v566_v19 }
 0x534   :  { %859 = shalt.err (!%p856_p12)
}
 0x535   :  { %s860_s26 = scalar_lea.hbm %s997_s6, 256 }
 0x536   :  { %p861_p13 = scmp.ne.s32.totalorder %s997_s6, %s860_s26  ;;  %p864_p0 = scmp.lt.u32.totalorder %s860_s26, %s997_s6 }
 0x538   :  { %p866_p1 = pnand %p864_p0, %p861_p13 }
 0x53a   :  { %869 = shalt.err (!%p866_p1)
}
 0x53b   :  { %581 = dma.vmem_to_hbm [thread:$0]  %s576_s23, 256, %s997_s6, [#allocation4], %s875_s7, %s875_s7, %s876_s8  }
 0x53c   :  { %872 = dma.done.wait [#allocation4], 256  }
 0x53d   :  { %873 = vsyncadd [#allocation4], 4294967040 }
 0x53e   :  { %585 = vsyncpa [#allocation3], 1 }
 0x53f   :  { %586 = vsyncpa [#allocation4], 1 }

</bundles_post_ra>
